<compile_context>
chip_gen: v5e
topology: v5e:2x2
jax: 0.10.0
libtpu: 0.0.40
codegen_flags: <defaults>
</compile_context>

<pallas_src>
import functools

import jax
import jax.numpy as jnp
from jax.experimental import pallas as pl
from jax.experimental.pallas import tpu as pltpu

MARGIN = 0.5
SIZE_AVERAGE = True
EPS = 1e-8           # matches F.cosine_similarity eps
NUM_PARTIALS = 2     # leading "parallel" grid axis (v7x has 2 TensorCores)


def _choose_batch_tile(batch: int, feat: int, itemsize: int) -> int:
    """Largest batch tile (multiple of 8) with one input tile <= ~2 MiB."""
    cap_bytes = 2 * 1024 * 1024
    tb = cap_bytes // max(1, feat * itemsize)
    tb = max(8, min(1024, (tb // 8) * 8))
    b_pad8 = ((batch + 7) // 8) * 8
    tb = min(tb, max(8, b_pad8))
    return max(8, (tb // 8) * 8)


def _contrastive_kernel(x_ref, y_ref, lbl_ref, out_ref, acc_ref, *,
                        margin, n_valid):
    tb = x_ref.shape[0]
    c = pl.program_id(0)          # parallel partial index (per-core on v7x)
    i = pl.program_id(1)          # reduction step over batch tiles
    n_i = pl.num_programs(1)

    @pl.when(i == 0)
    def _init():
        acc_ref[...] = jnp.zeros_like(acc_ref)

    x = x_ref[...]                # (TB, D) in input dtype (f32 or bf16)
    y = y_ref[...]
    lbl = lbl_ref[...].astype(jnp.float32)   # (TB, 1)

    # Single lane-reduction pass over the stacked products, f32 accumulation.
    # (Alternative: one MXU matvec against ones((D,1)) with
    #  preferred_element_type=f32 -- the kernel is HBM-bound either way.)
    prods = jnp.concatenate([x * y, x * x, y * y], axis=0)        # (3*TB, D)
    sums = jnp.sum(prods, axis=-1, keepdims=True, dtype=jnp.float32)
    dot = sums[0:tb]              # sum(x*y)  (TB, 1) f32
    sxx = sums[tb:2 * tb]         # sum(x*x)
    syy = sums[2 * tb:3 * tb]     # sum(y*y)

    # Cosine similarity: clamp each norm to eps (matches torch semantics for
    # all non-degenerate inputs), divide via EUP reciprocal.
    nx = jnp.maximum(jnp.sqrt(sxx), EPS)
    ny = jnp.maximum(jnp.sqrt(syy), EPS)
    cos = dot * pl.reciprocal(nx * ny, approx=False)
    dist = 1.0 - cos                                              # (TB, 1)

    hinge = jnp.maximum(margin - dist, 0.0)
    per = 0.5 * (lbl * dist * dist + (1.0 - lbl) * hinge * hinge)

    # Mask padded rows (global row index >= true batch size).
    row0 = (c * n_i + i) * tb
    rows = row0 + jax.lax.broadcasted_iota(jnp.int32, (tb, 1), 0)
    per = jnp.where(rows < n_valid, per, 0.0)

    acc_ref[...] += jnp.sum(per, keepdims=True)                   # (1,1) f32

    # Store the per-core partial once, as a lane-dense (8,128) block.
    @pl.when(i == n_i - 1)
    def _finalize():
        out_ref[...] = jnp.broadcast_to(acc_ref[...], out_ref.shape)


def contrastive_loss(sent_embs1, sent_embs2, labels,
                     margin=MARGIN, size_average=SIZE_AVERAGE):
    """sent_embs1, sent_embs2: [B, D] float; labels: [B] int/float (0 or 1)."""
    B, D = sent_embs1.shape
    itemsize = jnp.dtype(sent_embs1.dtype).itemsize

    TB = _choose_batch_tile(B, D, itemsize)
    tiles_total = pl.cdiv(B, TB)
    n_i = pl.cdiv(tiles_total, NUM_PARTIALS)      # reduction steps per partial
    B_pad = NUM_PARTIALS * n_i * TB

    labels_f = labels.reshape(B, 1).astype(jnp.float32)
    if B_pad != B:
        pad = B_pad - B
        x = jnp.pad(sent_embs1, ((0, pad), (0, 0)))
        y = jnp.pad(sent_embs2, ((0, pad), (0, 0)))
        l = jnp.pad(labels_f, ((0, pad), (0, 0)))
    else:
        x, y, l = sent_embs1, sent_embs2, labels_f

    kernel = functools.partial(_contrastive_kernel,
                               margin=float(margin), n_valid=B)

    out = pl.pallas_call(
        kernel,
        out_shape=jax.ShapeDtypeStruct((NUM_PARTIALS * 8, 128), jnp.float32),
        grid_spec=pltpu.PrefetchScalarGridSpec(
            num_scalar_prefetch=0,
            grid=(NUM_PARTIALS, n_i),
            in_specs=[
                pl.BlockSpec((TB, D), lambda c, i: (c * n_i + i, 0)),
                pl.BlockSpec((TB, D), lambda c, i: (c * n_i + i, 0)),
                pl.BlockSpec((TB, 1), lambda c, i: (c * n_i + i, 0)),
            ],
            out_specs=pl.BlockSpec((8, 128), lambda c, i: (c, 0)),
            scratch_shapes=[pltpu.VMEM((1, 1), jnp.float32)],
        ),
        compiler_params=pltpu.CompilerParams(
            dimension_semantics=("parallel", "arbitrary"),
        ),
        cost_estimate=pl.CostEstimate(
            flops=int(6 * B * D + 12 * B),
            transcendentals=int(3 * B),
            bytes_accessed=int(2 * B * D * itemsize + 4 * B + 4),
        ),
    )(x, y, l)

    # One scaled-to-(8,128) partial per parallel index; their [0,0] entries
    # hold the per-core sums.
    total = jnp.sum(out[::8, 0])
    return total / B if size_average else total


def _reference_loss(x, y, labels, margin=MARGIN, size_average=SIZE_AVERAGE):
    x = x.astype(jnp.float32)
    y = y.astype(jnp.float32)
    lf = labels.astype(jnp.float32)
    dot = jnp.sum(x * y, axis=-1)
    nx = jnp.maximum(jnp.sqrt(jnp.sum(x * x, axis=-1)), EPS)
    ny = jnp.maximum(jnp.sqrt(jnp.sum(y * y, axis=-1)), EPS)
    cos = dot / (nx * ny)
    d = 1.0 - cos
    per = 0.5 * (lf * d**2 + (1.0 - lf) * jnp.maximum(margin - d, 0.0) ** 2)
    return jnp.mean(per) if size_average else jnp.sum(per)


if __name__ == "__main__":
    key = jax.random.PRNGKey(0)
    k1, k2, k3 = jax.random.split(key, 3)

    B, D = 8, 32  # small synthetic sentence-embedding pairs
    sent_embs1 = jax.random.normal(k1, (B, D), dtype=jnp.float32)
    sent_embs2 = jax.random.normal(k2, (B, D), dtype=jnp.float32)
    labels = jax.random.bernoulli(k3, 0.5, (B,)).astype(jnp.int32)

    loss = contrastive_loss(sent_embs1, sent_embs2, labels)
    loss = jax.block_until_ready(loss)

    ref = _reference_loss(sent_embs1, sent_embs2, labels)
    assert jnp.allclose(loss, ref, rtol=1e-5, atol=1e-6), (loss, ref)

    print("KERNEL_OK")
</pallas_src>

<mosaic_0001>
module attributes {stable_mosaic.version = 11 : i64} {
  func.func @_contrastive_kernel(%arg0: i32, %arg1: i32, %arg2: memref<8x32xf32, #tpu.memory_space<vmem>>, %arg3: memref<8x32xf32, #tpu.memory_space<vmem>>, %arg4: memref<8x1xf32, #tpu.memory_space<vmem>>, %arg5: memref<8x128xf32, #tpu.memory_space<vmem>>, %arg6: memref<1x1xf32, #tpu.memory_space<vmem>>) attributes {dimension_semantics = [#tpu.dimension_semantics<parallel>, #tpu.dimension_semantics<arbitrary>], iteration_bounds = array<i64: 2, 1>, scalar_prefetch = 0 : i64, scratch_operands = 1 : i64, tpu.core_type = #tpu.core_type<tc>, window_params = [{transform_indices = @transform_0, window_bounds = array<i64: 8, 32>}, {transform_indices = @transform_1, window_bounds = array<i64: 8, 32>}, {transform_indices = @transform_2, window_bounds = array<i64: 8, 1>}, {transform_indices = @transform_3, window_bounds = array<i64: 8, 128>}]} {
    %c0_i32 = arith.constant 0 : i32
    %0 = arith.cmpi eq, %arg1, %c0_i32 : i32
    %1 = arith.extui %0 : i1 to i32
    %c0_i32_0 = arith.constant 0 : i32
    %2 = arith.cmpi ne, %1, %c0_i32_0 : i32
    scf.if %2 {
      %cst_22 = arith.constant 0.000000e+00 : f32
      %60 = vector.broadcast %cst_22 : f32 to vector<1x1xf32>
      %c0_23 = arith.constant 0 : index
      %c0_24 = arith.constant 0 : index
      %61 = vector.load %arg6[%c0_23, %c0_24] : memref<1x1xf32, #tpu.memory_space<vmem>>, vector<1x1xf32>
      tpu.vector_store %arg6[%c0_23, %c0_24], %60 {strides = array<i32>} : memref<1x1xf32, #tpu.memory_space<vmem>>, vector<1x1xf32>,
    } else {
    }
    %c0 = arith.constant 0 : index
    %c0_1 = arith.constant 0 : index
    %3 = vector.load %arg2[%c0, %c0_1] : memref<8x32xf32, #tpu.memory_space<vmem>>, vector<8x32xf32>
    %c0_2 = arith.constant 0 : index
    %c0_3 = arith.constant 0 : index
    %4 = vector.load %arg3[%c0_2, %c0_3] : memref<8x32xf32, #tpu.memory_space<vmem>>, vector<8x32xf32>
    %c0_4 = arith.constant 0 : index
    %c0_5 = arith.constant 0 : index
    %5 = vector.load %arg4[%c0_4, %c0_5] : memref<8x1xf32, #tpu.memory_space<vmem>>, vector<8x1xf32>
    %6 = arith.mulf %3, %4 : vector<8x32xf32>
    %7 = arith.mulf %3, %3 : vector<8x32xf32>
    %8 = arith.mulf %4, %4 : vector<8x32xf32>
    %9 = tpu.concatenate %6, %7, %8 in 0 : vector<8x32xf32>, vector<8x32xf32>, vector<8x32xf32> -> vector<24x32xf32>
    %cst = arith.constant dense<0.000000e+00> : vector<24xf32>
    %10 = vector.multi_reduction <add>, %9, %cst [1] : vector<24x32xf32> to vector<24xf32>
    %11 = vector.shape_cast %10 : vector<24xf32> to vector<24x1xf32>
    %12 = vector.extract_strided_slice %11 {offsets = [0, 0], sizes = [8, 1], strides = [1, 1]} : vector<24x1xf32> to vector<8x1xf32>
    %13 = vector.extract_strided_slice %11 {offsets = [8, 0], sizes = [8, 1], strides = [1, 1]} : vector<24x1xf32> to vector<8x1xf32>
    %14 = vector.extract_strided_slice %11 {offsets = [16, 0], sizes = [8, 1], strides = [1, 1]} : vector<24x1xf32> to vector<8x1xf32>
    %15 = math.sqrt %13 : vector<8x1xf32>
    %cst_6 = arith.constant 9.99999993E-9 : f32
    %16 = vector.broadcast %cst_6 : f32 to vector<8x1xf32>
    %17 = arith.maximumf %15, %16 : vector<8x1xf32>
    %18 = math.sqrt %14 : vector<8x1xf32>
    %cst_7 = arith.constant 9.99999993E-9 : f32
    %19 = vector.broadcast %cst_7 : f32 to vector<8x1xf32>
    %20 = arith.maximumf %18, %19 : vector<8x1xf32>
    %21 = arith.mulf %17, %20 : vector<8x1xf32>
    %22 = tpu.reciprocal %21 : vector<8x1xf32> -> vector<8x1xf32>
    %23 = arith.mulf %12, %22 : vector<8x1xf32>
    %cst_8 = arith.constant 1.000000e+00 : f32
    %24 = vector.broadcast %cst_8 : f32 to vector<8x1xf32>
    %25 = arith.subf %24, %23 : vector<8x1xf32>
    %cst_9 = arith.constant 5.000000e-01 : f32
    %26 = vector.broadcast %cst_9 : f32 to vector<8x1xf32>
    %27 = arith.subf %26, %25 : vector<8x1xf32>
    %cst_10 = arith.constant 0.000000e+00 : f32
    %28 = vector.broadcast %cst_10 : f32 to vector<8x1xf32>
    %29 = arith.maximumf %27, %28 : vector<8x1xf32>
    %30 = arith.mulf %5, %25 : vector<8x1xf32>
    %31 = arith.mulf %30, %25 : vector<8x1xf32>
    %cst_11 = arith.constant 1.000000e+00 : f32
    %32 = vector.broadcast %cst_11 : f32 to vector<8x1xf32>
    %33 = arith.subf %32, %5 : vector<8x1xf32>
    %34 = arith.mulf %33, %29 : vector<8x1xf32>
    %35 = arith.mulf %34, %29 : vector<8x1xf32>
    %36 = arith.addf %31, %35 : vector<8x1xf32>
    %cst_12 = arith.constant 5.000000e-01 : f32
    %37 = vector.broadcast %cst_12 : f32 to vector<8x1xf32>
    %38 = arith.mulf %37, %36 : vector<8x1xf32>
    %c1_i32 = arith.constant 1 : i32
    %39 = arith.muli %arg0, %c1_i32 : i32
    %40 = arith.addi %39, %arg1 : i32
    %c8_i32 = arith.constant 8 : i32
    %41 = arith.muli %40, %c8_i32 : i32
    %42 = tpu.iota {dimensions = array<i32: 0>} : vector<8x1xi32>
    %43 = vector.broadcast %41 : i32 to vector<8x1xi32>
    %44 = arith.addi %43, %42 : vector<8x1xi32>
    %c8_i32_13 = arith.constant 8 : i32
    %45 = vector.broadcast %c8_i32_13 : i32 to vector<8x1xi32>
    %46 = arith.cmpi slt, %44, %45 : vector<8x1xi32>
    %cst_14 = arith.constant 0.000000e+00 : f32
    %47 = vector.broadcast %cst_14 : f32 to vector<8x1xf32>
    %48 = arith.select %46, %38, %47 : vector<8x1xi1>, vector<8x1xf32>
    %c0_15 = arith.constant 0 : index
    %c0_16 = arith.constant 0 : index
    %49 = vector.load %arg6[%c0_15, %c0_16] : memref<1x1xf32, #tpu.memory_space<vmem>>, vector<1x1xf32>
    %50 = vector.shape_cast %48 : vector<8x1xf32> to vector<1x8x1xf32>
    %cst_17 = arith.constant dense<0.000000e+00> : vector<1xf32>
    %51 = vector.multi_reduction <add>, %50, %cst_17 [1, 2] : vector<1x8x1xf32> to vector<1xf32>
    %52 = vector.shape_cast %51 : vector<1xf32> to vector<1x1x1xf32>
    %53 = vector.extract %52[0, 0, 0] : f32 from vector<1x1x1xf32>
    %54 = vector.broadcast %53 : f32 to vector<1x1xf32>
    %55 = arith.addf %49, %54 : vector<1x1xf32>
    %c0_18 = arith.constant 0 : index
    %c0_19 = arith.constant 0 : index
    %56 = vector.load %arg6[%c0_18, %c0_19] : memref<1x1xf32, #tpu.memory_space<vmem>>, vector<1x1xf32>
    tpu.vector_store %arg6[%c0_18, %c0_19], %55 {strides = array<i32>} : memref<1x1xf32, #tpu.memory_space<vmem>>, vector<1x1xf32>,
    %c0_i32_20 = arith.constant 0 : i32
    %57 = arith.cmpi eq, %arg1, %c0_i32_20 : i32
    %58 = arith.extui %57 : i1 to i32
    %c0_i32_21 = arith.constant 0 : i32
    %59 = arith.cmpi ne, %58, %c0_i32_21 : i32
    scf.if %59 {
      %c0_22 = arith.constant 0 : index
      %c0_23 = arith.constant 0 : index
      %60 = vector.load %arg6[%c0_22, %c0_23] : memref<1x1xf32, #tpu.memory_space<vmem>>, vector<1x1xf32>
      %61 = vector.shape_cast %60 : vector<1x1xf32> to vector<1x1xf32>
      %62 = vector.broadcast %61 : vector<1x1xf32> to vector<8x128xf32>
      %c0_24 = arith.constant 0 : index
      %c0_25 = arith.constant 0 : index
      %63 = vector.load %arg5[%c0_24, %c0_25] : memref<8x128xf32, #tpu.memory_space<vmem>>, vector<8x128xf32>
      tpu.vector_store %arg5[%c0_24, %c0_25], %62 {strides = array<i32>} : memref<8x128xf32, #tpu.memory_space<vmem>>, vector<8x128xf32>,
    } else {
    }
    return
  }
  func.func @transform_0(%arg0: i32, %arg1: i32) -> (i32, i32) {
    %c1_i32 = arith.constant 1 : i32
    %0 = arith.muli %arg0, %c1_i32 : i32
    %1 = arith.addi %0, %arg1 : i32
    %c0_i32 = arith.constant 0 : i32
    %c0_i32_0 = arith.constant 0 : i32
    return %1, %c0_i32 : i32, i32
  }
  func.func @transform_1(%arg0: i32, %arg1: i32) -> (i32, i32) {
    %c1_i32 = arith.constant 1 : i32
    %0 = arith.muli %arg0, %c1_i32 : i32
    %1 = arith.addi %0, %arg1 : i32
    %c0_i32 = arith.constant 0 : i32
    %c0_i32_0 = arith.constant 0 : i32
    return %1, %c0_i32 : i32, i32
  }
  func.func @transform_2(%arg0: i32, %arg1: i32) -> (i32, i32) {
    %c1_i32 = arith.constant 1 : i32
    %0 = arith.muli %arg0, %c1_i32 : i32
    %1 = arith.addi %0, %arg1 : i32
    %c0_i32 = arith.constant 0 : i32
    %c0_i32_0 = arith.constant 0 : i32
    return %1, %c0_i32 : i32, i32
  }
  func.func @transform_3(%arg0: i32, %arg1: i32) -> (i32, i32) {
    %c0_i32 = arith.constant 0 : i32
    %c0_i32_0 = arith.constant 0 : i32
    return %arg0, %c0_i32 : i32, i32
  }
}

</mosaic_0001>

<bundles_post_ra>
// kernel: tpu_custom_call.1
= control target key start
LH: loop header
LB: loop body
LE: loop exit
PB: predicated region body
PF: predicated region fallthrough
CT: control target
= control target key end

     0   :  { %8 = vsyncpa [#allocation4], 0  ;;  %s852_s0 = inlined_call_operand.vmem [shape: f32[16,32], index: 0, kind: input, shape index: {}]   ;;  %s853_s1 = inlined_call_operand.hbm [shape: f32[16,32], index: 1, kind: input, shape index: {}]   ;;  %s854_s2 = inlined_call_operand.vmem [shape: f32[16,1], index: 2, kind: input, shape index: {}]   ;;  %s855_s3 = inlined_call_operand.hbm [shape: f32[16,128], index: 3, kind: output, shape index: {}]  }
   0x1   :  { %10 = vsyncpa [#allocation4 + $0x1], 0 }
   0x2   :  { %11 = vsyncpa [#allocation5], 0 }
   0x3   :  { %13 = vsyncpa [#allocation5 + $0x1], 0  ;;  %s707_s12 = smov 0   ;;  %s709_s13 = smov 0  }
   0x4   :  { %s711_s14 = smov 0   ;;  %s713_s15 = smov 0  }
   0x5   :  { %s715_s16 = smov 0   ;;  %s717_s17 = smov 0  }
   0x6 LB: > { %s480_s18 = sadd.s32 4294967295, %s683_s17   ;;  %s481_s19 = sadd.s32 4294967294, %s683_s17   ;;  %s683_s17 = sphi %s717_s17, %s19_s17   ;;  %s679_s16 = sphi %s715_s16, %s864_s16   ;;  %s675_s15 = sphi %s713_s15, %s863_s15   ;;  %s671_s14 = sphi %s711_s14, %s862_s14   ;;  %s667_s13 = sphi %s709_s13, %s861_s13   ;;  %s663_s12 = sphi %s707_s12, %s860_s12  }
   0x7   : > { %s31_s20 = sadd.s32 1, %s679_s16  ;;  %s68_s21 = sadd.s32 1, %s671_s14 }
   0x8   : > { %p33_p0 = scmp.ge.s32.totalorder %s31_s20, 2  ;;  %p75_p1 = scmp.ne.s32.totalorder %s671_s14, %s667_s13 }
   0x9   : > { %p76_p2 = scmp.eq.s32.totalorder %s683_s17, 0  ;;  %p81_p3 = scmp.ne.s32.totalorder %s667_s13, %s663_s12 }
   0xa   : > { %s866_s20 = smov (%p33_p0, %s31_s20), 0  ;;  %p82_p5 = scmp.eq.s32.totalorder %s480_s18, 0 }
   0xb   : > { %p748_p4 = por %p76_p2, %p75_p1  ;;  %s65_s23 = ssub.s32 %s679_s16, %s866_s20 }
   0xc   : > { %p133_p6 = scmp.eq.s32.totalorder %s480_s18, 1  ;;  %p66_p7 = scmp.eq.s32.totalorder %s65_s23, 0 }
   0xd   : > { %p754_p8 = por %p82_p5, %p81_p3  ;;  %p139_p10 = scmp.eq.s32.totalorder %s481_s19, 1 }
   0xe   : > { %p758_p9 = por %p133_p6, %p75_p1  ;;  %p483_p12 = scmp.ge.s32.totalorder %s683_s17, 2 }
   0xf   : > { %s763_s26 = scalar_select %p66_p7, %s671_s14, %s68_s21  }
  0x10   : > { %p765_p11 = por %p139_p10, %p81_p3  ;;  %p510_p13 = scmp.lt.s32.totalorder %s683_s17, 2 }
  0x11   : > { %s168_s28 = sand.u32 1, %s671_s14   ;;  %s485_s30 = sshll.u32 %s679_s16, 3 }
  0x12   : > { %s484_s29 = sshll.u32 %s168_s28, 3  ;;  %s177_s6 = scalar_lea.hbm %s853_s1, %s485_s30 }
  0x13   : > { %s172_s7 = scalar_lea.vmem [#allocation3], %s484_s29  ;;  %s179_s9 = sshll.u32 %s177_s6, 4  ;;  %s180_s9 = int_to_ptr.hbm [resolvable:$true] %s179_s9 }
  0x14   : > { %s181_s8 = sshll.u32 %s172_s7, 4  ;;  %p503_p0 = pnand %p510_p13, %p748_p4  ;;  %s182_s8 = int_to_ptr.vmem [resolvable:$true] %s181_s8 }
  0x15   : > { %p486_p1 = scmp.ge.s32.totalorder %s683_s17, 1  ;;  %p195_p2 = scmp.lt.s32.totalorder %s683_s17, 3 }
  0x16   : > { %s169_s10 = scalar_lea.sflag [#allocation4], %s168_s28 }
  0x17   : > { %505 = dma.hbm_to_vmem [thread:$0]  (!%p503_p0), %s180_s9, 128, %s182_s8, %s169_s10  }
  0x18   : > { %p196_p3 = pnand %p486_p1, %p195_p2 }
  0x19   : > { %s781_s11 = sand.u32 (!%p196_p3), 1, %s667_s13  }
  0x1a   : > { %199 = sbr.rel (%p196_p3) target bundleno = 509 (0x1fd), region = 32  ;;  %s487_s18 = sshll.u32 (!%p196_p3), %s781_s11, 3 }
  0x1b   : > { %s202_s19 = scalar_lea.sflag (!%p196_p3), [#allocation4], %s781_s11  ;;  %s205_s21 = scalar_lea.vmem (!%p196_p3), [#allocation3], %s487_s18 }
  0x1f   : > { %654 = dma.done.wait (%p754_p8), %s202_s19, 128  }
  0x20   : > { %656 = vsyncadd (%p754_p8), %s202_s19, 4294967168  ;;  %p240_p4 = scmp.lt.s32.totalorder %s675_s15, 1  ;;  %vm264_vm0 = vcmask 261120   ;;  %v259_v1 = vld [vmem:[%s205_s21] sm:$0xff]  ;;  %v328_v45 = vlaneseq  ;;  %s491_s6 = sshll.u32 %s675_s15, 3  ;;  %vm335_vm10 = vcmask 7168  }
  0x21   : > { %v263_v6 = vmul.f32 %v259_v1, %v259_v1  ;;  %v330_v53 = vstv %s491_s6  ;;  %vm256_vm11 = vcmask 0   ;;  %v685_v62 = vmov 0.0   ;;  %s372_s10 = scalar_lea.hbm %s855_s3, %s491_s6  ;;  %s238_s19 = scalar_lea.vmem [#allocation6], %s487_s18 }
  0x22   : > { %s793_s22 = scalar_select %p240_p4, %s675_s15, 1  ;;  %v329_v50 = vshrl.u32 %v328_v45, 7  ;;  %257 = vst.msk [vmem:[#allocation2] sm:$0x1] %vm256_vm11, %v685_v62 }
  0x23   : > { %v271_v7 = vsel %vm264_vm0, %v263_v6, 0.0  ;;  %v686_v6 = vmov 0   ;;  %s374_s21 = sshll.u32 %s238_s19, 4  ;;  %s621_s24 = scalar_lea.hbm %s855_s3, 16  ;;  %s375_s21 = int_to_ptr.vmem [resolvable:$true] %s374_s21 }
  0x24   : > { %s489_s23 = sshll.u32 %s793_s22, 3  ;;  %v331_v55 = vadd.s32 %v330_v53, %v329_v50  ;;  %562 = vset.pattern.permute.xlu2 %v686_v6  ;;  %563 = vset.pattern.permute.xlu0 %v686_v6  ;;  %s376_s22 = sshll.u32 %s372_s10, 4  ;;  %s377_s22 = int_to_ptr.hbm [resolvable:$true] %s376_s22 }
  0x25   : > { %s243_s30 = scalar_lea.vmem %s852_s0, %s489_s23  ;;  %s250_s5 = scalar_lea.vmem %s854_s2, %s489_s23 }
  0x26   : > { %v258_v0 = vld [vmem:[%s243_s30] sm:$0xff]  ;;  %vm332_vm9 = vcmp.lt.s32.totalorder %v331_v55, 8  ;;  %s362_s23 = scalar_lea.sflag [#allocation5], %s781_s11  ;;  %s615_s28 = sshra.s32 %s377_s22, 4  ;;  %s616_s28 = int_to_ptr.hbm [resolvable:$true] %s615_s28 }
  0x27   : > { %v262_v2 = vmul.f32 %v258_v0, %v258_v0  ;;  %v261_v3 = vmul.f32 %v259_v1, %v258_v0  ;;  %v260_v47 = vld [vmem:[%s250_s5] sm:$0xff]  ;;  %s617_s29 = scalar_lea.hbm %s616_s28, 8  ;;  %p622_p8 = scmp.lt.s32.totalorder %s616_s28, %s855_s3 }
  0x28   : > { %v321_v48 = vsub.f32 1.0, %v260_v47  ;;  %p618_p5 = scmp.ne.s32.totalorder %s616_s28, %s617_s29  ;;  %p623_p10 = scmp.lt.s32.totalorder %s621_s24, %s617_s29 }
  0x29   : > { %v268_v4 = vsel %vm264_vm0, %v262_v2, 0.0  ;;  %v265_v5 = vsel %vm264_vm0, %v261_v3, 0.0 }
  0x2a   : > { %269 = vadd.xlane.f32.xlu0 %v268_v4  ;;  %266 = vadd.xlane.f32.xlu1 %v265_v5  ;;  %p619_p6 = pnand %p618_p5, %p758_p9  ;;  %p624_p13 = por %p623_p10, %p622_p8 }
  0x2c   : > { %p620_p7 = pneg %p619_p6 }
  0x2e   : > { %p625_p0 = pnand %p624_p13, %p620_p7 }
  0x32   : > { %272 = vadd.xlane.f32.xlu0 %v271_v7  ;;  %v334_v7 = vld [vmem:[#allocation2] sm:$0x1] }
  0x9d   : > { %v270_v8 = vpop.xlane.xlu0 %269  ;;  %v267_v41 = vpop.xlane.xlu1 %266 }
  0x9e   : > { %565 = vrsqrt.f32 %v270_v8  ;;  %vm281_vm1 = vcmp.eq.f32.partialorder %v270_v8, inf  ;;  %v284_v24 = vand.u32 2147483648, %v270_v8  ;;  %vm283_vm2 = vcmp.eq.f32.partialorder %v270_v8, 0.0 }
  0xa4   : > { %v566_v9 = vpop.eup %565 }
  0xa5   : > { %v275_v10 = vmul.f32 %v566_v9, %v270_v8  ;;  %v273_v11 = vpop.xlane.xlu0 %272 }
  0xa6   : > { %567 = vrsqrt.f32 %v273_v11  ;;  %vm294_vm3 = vcmp.eq.f32.partialorder %v273_v11, inf  ;;  %v297_v27 = vand.u32 2147483648, %v273_v11  ;;  %vm296_vm4 = vcmp.eq.f32.partialorder %v273_v11, 0.0 }
  0xa7   : > { %v276_v12 = vmul.f32 %v566_v9, %v275_v10 }
  0xa9   : > { %v277_v13 = vmul.f32 0.5, %v276_v12 }
  0xab   : > { %v278_v14 = vsub.f32 1.5, %v277_v13 }
  0xac   : > { %v568_v15 = vpop.eup %567 }
  0xad   : > { %v279_v16 = vmul.f32 %v566_v9, %v278_v14  ;;  %v288_v17 = vmul.f32 %v568_v15, %v273_v11 }
  0xaf   : > { %v289_v18 = vmul.f32 %v568_v15, %v288_v17  ;;  %v280_v19 = vmul.f32 %v279_v16, %v270_v8 }
  0xb1   : > { %v290_v20 = vmul.f32 0.5, %v289_v18  ;;  %v282_v22 = vsel %vm281_vm1, %v270_v8, %v280_v19 }
  0xb2   : > { %v285_v26 = vsel %vm283_vm2, %v284_v24, %v282_v22 }
  0xb3   : > { %v291_v21 = vsub.f32 1.5, %v290_v20  ;;  %v286_v30 = vmax.f32 %v285_v26, 1e-08 }
  0xb5   : > { %v292_v23 = vmul.f32 %v568_v15, %v291_v21 }
  0xb7   : > { %v293_v25 = vmul.f32 %v292_v23, %v273_v11 }
  0xb9   : > { %v295_v28 = vsel %vm294_vm3, %v273_v11, %v293_v25 }
  0xba   : > { %v298_v29 = vsel %vm296_vm4, %v297_v27, %v295_v28 }
  0xbb   : > { %v299_v31 = vmax.f32 %v298_v29, 1e-08 }
  0xbd   : > { %v300_v32 = vmul.f32 %v299_v31, %v286_v30 }
  0xbf   : > { %569 = vrcp.f32 %v300_v32  ;;  %v312_v36 = vand.u32 2147483648, %v300_v32  ;;  %v310_v38 = vand.u32 2147483647, %v300_v32  ;;  %vm306_vm6 = vweird.f32 %v300_v32 }
  0xc1   : > { %v313_v40 = vor.u32 1.1754944e-38, %v312_v36  ;;  %vm311_vm8 = vcmp.eq.f32.partialorder %v310_v38, 8.507059e+37 }
  0xc5   : > { %v570_v33 = vpop.eup %569 }
  0xc6   : > { %v302_v34 = vmul.f32 %v570_v33, %v300_v32  ;;  %vm307_vm5 = vweird.f32 %v570_v33 }
  0xc7   : > { %vm308_vm7 = vmor %vm306_vm6, %vm307_vm5 }
  0xc8   : > { %v303_v35 = vsub.f32 1.0, %v302_v34 }
  0xca   : > { %v304_v37 = vmul.f32 %v570_v33, %v303_v35 }
  0xcc   : > { %v305_v39 = vadd.f32 %v570_v33, %v304_v37 }
  0xce   : > { %v309_v42 = vsel %vm308_vm7, %v570_v33, %v305_v39 }
  0xcf   : > { %v314_v43 = vsel %vm311_vm8, %v313_v40, %v309_v42 }
  0xd0   : > { %v315_v44 = vmul.f32 %v314_v43, %v267_v41 }
  0xd2   : > { %v316_v46 = vsub.f32 1.0, %v315_v44 }
  0xd4   : > { %v317_v49 = vsub.f32 0.5, %v316_v46  ;;  %v319_v52 = vmul.f32 %v316_v46, %v260_v47 }
  0xd6   : > { %v318_v51 = vmax.f32 %v317_v49, 0.0  ;;  %v320_v56 = vmul.f32 %v319_v52, %v316_v46 }
  0xd8   : > { %v322_v54 = vmul.f32 %v321_v48, %v318_v51 }
  0xda   : > { %v323_v57 = vmul.f32 %v322_v54, %v318_v51 }
  0xdc   : > { %v324_v58 = vadd.f32 %v323_v57, %v320_v56 }
  0xde   : > { %v325_v59 = vmul.f32 0.5, %v324_v58 }
  0xe0   : > { %v333_v60 = vsel %vm332_vm9, %v325_v59, 0.0 }
  0xe1   : > { %v336_v61 = vsel %vm335_vm10, %v333_v60, 0.0 }
  0xe2   : > { %337 = vadd.xlane.f32.xlu1 %v336_v61 }
 0x155   : > { %v338_v63 = vpop.xlane.xlu1 %337 }
 0x156   : > { %v339_v0 = vrot.slane %v338_v63, 4 }
 0x158   : > { %v340_v1 = vadd.f32 %v339_v0, %v338_v63 }
 0x15a   : > { %v341_v2 = vrot.slane %v340_v1, 2 }
 0x15c   : > { %v342_v3 = vadd.f32 %v341_v2, %v340_v1 }
 0x15e   : > { %v343_v4 = vrot.slane %v342_v3, 1 }
 0x160   : > { %v344_v5 = vadd.f32 %v343_v4, %v342_v3 }
 0x162   : > { %496 = vpush %v344_v5 }
 0x193   : > { %s497_s7 = spop %496 }
 0x194   : > { %v346_v8 = vstv %s497_s7 }
 0x195   : > { %v347_v9 = vadd.f32 %v346_v8, %v334_v7 }
 0x197   : > { %349 = vst.msk [vmem:[#allocation2] sm:$0x1] %vm256_vm11, %v347_v9 }
 0x19e   : > { %v564_v10 = vld [vmem:[#allocation2] ss:$0 sm:$0xff] }
 0x19f   : > { %357 = vperm.xlu2 %562, %v564_v10  }
 0x1f9   : > { %v358_v11 = vpop.permute.xlu2 %357 }
 0x1fa   : > { %360 = vst [vmem:[%s238_s19] sm:$0xff] %v358_v11 }
 0x1fb   : > { %628 = shalt.err (!%p625_p0)
}
 0x1fc   : > { %500 = dma.vmem_to_hbm [thread:$0]  (%p758_p9), %s375_s21, 128, %s377_s22, %s362_s23  }
 0x1fd PF: > { %s388_s11 = sand.u32 1, %s663_s12   ;;  %p507_p1 = pnand %p483_p12, %p765_p11 }
 0x1fe   : > { %s389_s5 = scalar_lea.sflag [#allocation5], %s388_s11 }
 0x1ff   : > { %p508_p2 = pneg %p507_p1 }
 0x201   : > { %658 = dma.done.wait (%p508_p2), %s389_s5, 128  }
 0x202   : > { %660 = vsyncadd (%p508_p2), %s389_s5, 4294967168  ;;  %s19_s17 = sadd.s32 1, %s683_s17   ;;  %s860_s12 = smov %s667_s13 }
 0x203   : > { %p16_p3 = scmp.ge.s32.totalorder %s19_s17, 4   ;;  %s861_s13 = smov %s671_s14 }
 0x204   : > { %s862_s14 = smov %s763_s26  ;;  %s863_s15 = smov %s679_s16 }
 0x205   : > { %s864_s16 = smov %s866_s20  ;;  %18 = sbr.rel (!%p16_p3) target bundleno = 6 (0x6), region = 91 }
 0x20a   :  { %395 = vsyncpa [#allocation4], 1 }
 0x20b   :  { %397 = vsyncpa [#allocation4 + $0x1], 1 }
 0x20c   :  { %398 = vsyncpa [#allocation5], 1 }
 0x20d   :  { %400 = vsyncpa [#allocation5 + $0x1], 1 }

</bundles_post_ra>
